<compile_context>
chip_gen: v5e
topology: v5e:2x2
jax: 0.10.0
libtpu: 0.0.40
codegen_flags: <defaults>
</compile_context>

<pallas_src>
import functools

import jax
import jax.numpy as jnp
from jax.experimental import pallas as pl
from jax.experimental.pallas import tpu as pltpu

SUBLANE = 8


def _round_up(x, m):
    return (x + m - 1) // m * m


def mlp_kernel(x_ref, w1_ref, b1_ref, w2_ref, b2_ref, o_ref):
    # x_ref:  (TB, D) f32     w1_ref: (D, H) bf16   b1_ref: (1, H) f32
    # w2_ref: (H, C)  bf16    b2_ref: (1, C) f32    o_ref:  (TB, C) f32
    xb = x_ref[...].astype(w1_ref.dtype)                  # bf16 cast on VPU (free; mem-bound)
    h = jnp.dot(xb, w1_ref[...],
                preferred_element_type=jnp.float32)       # (TB, H) f32 acc on MXU
    h = jnp.maximum(h + b1_ref[...], 0.0)                 # bias + ReLU in f32 (v5e-safe)
    o = jnp.dot(h.astype(w2_ref.dtype), w2_ref[...],
                preferred_element_type=jnp.float32)       # (TB, C) f32 acc
    o_ref[...] = o + b2_ref[...]


def prepare_params(w1, b1, w2, b2):
    """One-time parameter prep, hoisted out of the per-call path:
    weights cast to MXU-native bf16, biases kept f32 as (1, N) rows.
    No HBM-side lane padding -- kernel blocks use full-array extents."""
    return (w1.astype(jnp.bfloat16),
            b1.astype(jnp.float32).reshape(1, -1),
            w2.astype(jnp.bfloat16),
            b2.astype(jnp.float32).reshape(1, -1))


@functools.partial(jax.jit, static_argnames=("tb",))
def mlp_forward(x, params, *, tb=512):
    """x: (B, D) float; params from prepare_params.  Returns (B, C) float32."""
    w1, b1, w2, b2 = params
    B, D = x.shape
    H = w1.shape[1]
    C = w2.shape[1]

    # Batch tile: at least 2 grid steps when B > 8 (megacore sharding on v7x
    # + DMA/compute pipelining), capped at `tb` rows for large batches.
    TB = max(SUBLANE, min(_round_up(tb, SUBLANE),
                          _round_up(pl.cdiv(B, 2), SUBLANE)))
    Bp = _round_up(B, TB)

    # Only pad the batch remainder (zeros); x is otherwise passed through.
    xp = x if Bp == B else jnp.zeros((Bp, D), x.dtype).at[:B].set(x)

    grid = (Bp // TB,)

    out = pl.pallas_call(
        mlp_kernel,
        out_shape=jax.ShapeDtypeStruct((Bp, C), jnp.float32),
        grid_spec=pltpu.PrefetchScalarGridSpec(
            num_scalar_prefetch=0,
            grid=grid,
            in_specs=[
                pl.BlockSpec((TB, D), lambda i: (i, 0)),   # x: batch-tiled
                pl.BlockSpec((D, H), lambda i: (0, 0)),    # w1: VMEM-resident
                pl.BlockSpec((1, H), lambda i: (0, 0)),    # b1: resident
                pl.BlockSpec((H, C), lambda i: (0, 0)),    # w2: resident
                pl.BlockSpec((1, C), lambda i: (0, 0)),    # b2: resident
            ],
            out_specs=pl.BlockSpec((TB, C), lambda i: (i, 0)),
        ),
        compiler_params=pltpu.CompilerParams(
            dimension_semantics=("parallel",),             # shards batch across TCs
            vmem_limit_bytes=32 * 1024 * 1024,             # headroom-safe on v7x
        ),
    )(xp, w1, b1, w2, b2)

    return out if Bp == B else out[:B]


def init_linear_params(key, in_features, out_features):
    """Deterministic init mimicking torch.nn.Linear (uniform +-1/sqrt(fan_in))."""
    kw, kb = jax.random.split(key)
    bound = 1.0 / jnp.sqrt(jnp.float32(in_features))
    # Stored as [in, out] so the kernel computes x @ W + b (== PyTorch x @ W.T + b).
    w = jax.random.uniform(kw, (in_features, out_features), jnp.float32,
                           minval=-bound, maxval=bound)
    b = jax.random.uniform(kb, (out_features,), jnp.float32,
                           minval=-bound, maxval=bound)
    return w, b


if __name__ == "__main__":
    # Shapes implied by the module spec: x = randn(64, 1, 48, 48) flattened
    # to (64, 2304), fc1 -> 50, fc2 -> num_classes=10.
    batch = 64
    input_size = 48 * 48
    hidden = 50
    num_classes = 10

    key = jax.random.PRNGKey(0)
    kx, k1, k2 = jax.random.split(key, 3)

    x = jax.random.normal(kx, (batch, 1, 48, 48), jnp.float32).reshape(batch, -1)
    w1, b1 = init_linear_params(k1, input_size, hidden)
    w2, b2 = init_linear_params(k2, hidden, num_classes)

    # One-time weight prep (cast to bf16, reshape biases) -- not per call.
    params = prepare_params(w1, b1, w2, b2)

    out = mlp_forward(x, params)          # B=64 -> TB=32 -> grid=(2,)
    out = jax.block_until_ready(out)

    # Reference in plain JAX, mirroring the kernel's bf16-operand /
    # f32-accumulate path so the comparison is tight.
    f32 = jnp.float32
    xb = x.astype(jnp.bfloat16).astype(f32)
    w1b = w1.astype(jnp.bfloat16).astype(f32)
    w2b = w2.astype(jnp.bfloat16).astype(f32)
    h_ref = jnp.maximum(xb @ w1b + b1, 0.0)
    h_ref = h_ref.astype(jnp.bfloat16).astype(f32)
    ref = h_ref @ w2b + b2

    assert out.shape == (batch, num_classes)
    assert out.dtype == jnp.float32
    assert jnp.allclose(out, ref, atol=2e-3, rtol=2e-3), (
        float(jnp.max(jnp.abs(out - ref))))

    print("KERNEL_OK")
</pallas_src>

<mosaic_0001>
module attributes {stable_mosaic.version = 11 : i64} {
  func.func @mlp_kernel(%arg0: i32, %arg1: memref<32x2304xf32, #tpu.memory_space<vmem>>, %arg2: memref<2304x50xbf16, #tpu.memory_space<vmem>>, %arg3: memref<1x50xf32, #tpu.memory_space<vmem>>, %arg4: memref<50x10xbf16, #tpu.memory_space<vmem>>, %arg5: memref<1x10xf32, #tpu.memory_space<vmem>>, %arg6: memref<32x10xf32, #tpu.memory_space<vmem>>) attributes {dimension_semantics = [#tpu.dimension_semantics<parallel>], iteration_bounds = array<i64: 2>, scalar_prefetch = 0 : i64, scratch_operands = 0 : i64, tpu.core_type = #tpu.core_type<tc>, window_params = [{transform_indices = @transform_0, window_bounds = array<i64: 32, 2304>}, {pipeline_mode = #tpu.pipeline_mode<synchronous>, transform_indices = @transform_1, window_bounds = array<i64: 2304, 50>}, {pipeline_mode = #tpu.pipeline_mode<synchronous>, transform_indices = @transform_2, window_bounds = array<i64: 1, 50>}, {pipeline_mode = #tpu.pipeline_mode<synchronous>, transform_indices = @transform_3, window_bounds = array<i64: 50, 10>}, {pipeline_mode = #tpu.pipeline_mode<synchronous>, transform_indices = @transform_4, window_bounds = array<i64: 1, 10>}, {transform_indices = @transform_5, window_bounds = array<i64: 32, 10>}]} {
    %c0 = arith.constant 0 : index
    %c0_0 = arith.constant 0 : index
    %0 = vector.load %arg1[%c0, %c0_0] : memref<32x2304xf32, #tpu.memory_space<vmem>>, vector<32x2304xf32>
    %1 = arith.truncf %0 : vector<32x2304xf32> to vector<32x2304xbf16>
    %c0_1 = arith.constant 0 : index
    %c0_2 = arith.constant 0 : index
    %2 = vector.load %arg2[%c0_1, %c0_2] : memref<2304x50xbf16, #tpu.memory_space<vmem>>, vector<2304x50xbf16>
    %cst = arith.constant dense<0.000000e+00> : vector<32x50xf32>
    %3 = tpu.matmul %1, %2, %cst {dimension_numbers = #tpu.dot_dimension_numbers<[1], [0], [0], [1], [0, 0, 1, 1], [], []>} : vector<32x2304xbf16>, vector<2304x50xbf16>, vector<32x50xf32> -> vector<32x50xf32>
    %c0_3 = arith.constant 0 : index
    %c0_4 = arith.constant 0 : index
    %4 = vector.load %arg3[%c0_3, %c0_4] : memref<1x50xf32, #tpu.memory_space<vmem>>, vector<1x50xf32>
    %5 = vector.broadcast %4 : vector<1x50xf32> to vector<32x50xf32>
    %6 = arith.addf %3, %5 : vector<32x50xf32>
    %cst_5 = arith.constant 0.000000e+00 : f32
    %7 = vector.broadcast %cst_5 : f32 to vector<32x50xf32>
    %8 = arith.maximumf %6, %7 : vector<32x50xf32>
    %9 = arith.truncf %8 : vector<32x50xf32> to vector<32x50xbf16>
    %c0_6 = arith.constant 0 : index
    %c0_7 = arith.constant 0 : index
    %10 = vector.load %arg4[%c0_6, %c0_7] : memref<50x10xbf16, #tpu.memory_space<vmem>>, vector<50x10xbf16>
    %cst_8 = arith.constant dense<0.000000e+00> : vector<32x10xf32>
    %11 = tpu.matmul %9, %10, %cst_8 {dimension_numbers = #tpu.dot_dimension_numbers<[1], [0], [0], [1], [0, 0, 1, 1], [], []>} : vector<32x50xbf16>, vector<50x10xbf16>, vector<32x10xf32> -> vector<32x10xf32>
    %c0_9 = arith.constant 0 : index
    %c0_10 = arith.constant 0 : index
    %12 = vector.load %arg5[%c0_9, %c0_10] : memref<1x10xf32, #tpu.memory_space<vmem>>, vector<1x10xf32>
    %13 = vector.broadcast %12 : vector<1x10xf32> to vector<32x10xf32>
    %14 = arith.addf %11, %13 : vector<32x10xf32>
    %c0_11 = arith.constant 0 : index
    %c0_12 = arith.constant 0 : index
    %15 = vector.load %arg6[%c0_11, %c0_12] : memref<32x10xf32, #tpu.memory_space<vmem>>, vector<32x10xf32>
    tpu.vector_store %arg6[%c0_11, %c0_12], %14 {strides = array<i32>} : memref<32x10xf32, #tpu.memory_space<vmem>>, vector<32x10xf32>,
    return
  }
  func.func @transform_0(%arg0: i32) -> (i32, i32) {
    %c0_i32 = arith.constant 0 : i32
    %c0_i32_0 = arith.constant 0 : i32
    return %arg0, %c0_i32 : i32, i32
  }
  func.func @transform_1(%arg0: i32) -> (i32, i32) {
    %c0_i32 = arith.constant 0 : i32
    %c0_i32_0 = arith.constant 0 : i32
    %c0_i32_1 = arith.constant 0 : i32
    return %c0_i32, %c0_i32_0 : i32, i32
  }
  func.func @transform_2(%arg0: i32) -> (i32, i32) {
    %c0_i32 = arith.constant 0 : i32
    %c0_i32_0 = arith.constant 0 : i32
    %c0_i32_1 = arith.constant 0 : i32
    return %c0_i32, %c0_i32_0 : i32, i32
  }
  func.func @transform_3(%arg0: i32) -> (i32, i32) {
    %c0_i32 = arith.constant 0 : i32
    %c0_i32_0 = arith.constant 0 : i32
    %c0_i32_1 = arith.constant 0 : i32
    return %c0_i32, %c0_i32_0 : i32, i32
  }
  func.func @transform_4(%arg0: i32) -> (i32, i32) {
    %c0_i32 = arith.constant 0 : i32
    %c0_i32_0 = arith.constant 0 : i32
    %c0_i32_1 = arith.constant 0 : i32
    return %c0_i32, %c0_i32_0 : i32, i32
  }
  func.func @transform_5(%arg0: i32) -> (i32, i32) {
    %c0_i32 = arith.constant 0 : i32
    %c0_i32_0 = arith.constant 0 : i32
    return %arg0, %c0_i32 : i32, i32
  }
}

</mosaic_0001>

<bundles_post_ra>
// kernel: mlp_forward.1
= control target key start
LH: loop header
LB: loop body
LE: loop exit
PB: predicated region body
PF: predicated region fallthrough
CT: control target
= control target key end

     0   :  { %s2772_s18 = smov 0   ;;  %s3319_s0 = inlined_call_operand.vmem [shape: f32[64,2304], index: 0, kind: input, shape index: {}]   ;;  %s3320_s1 = inlined_call_operand.vmem [shape: bf16[2304,50], index: 1, kind: input, shape index: {}]   ;;  %s3321_s2 = inlined_call_operand.vmem [shape: f32[1,50], index: 2, kind: input, shape index: {}]   ;;  %s3322_s3 = inlined_call_operand.vmem [shape: bf16[50,10], index: 3, kind: input, shape index: {}]   ;;  %s3323_s4 = inlined_call_operand.vmem [shape: f32[1,10], index: 4, kind: input, shape index: {}]   ;;  %s3324_s5 = inlined_call_operand.vmem [shape: f32[64,10], index: 5, kind: output, shape index: {}]  }
   0x1 LB: > { %s1967_s19 = sadd.s32 4294967295, %s2740_s18   ;;  %p1971_p0 = scmp.ge.s32.totalorder %s2740_s18, 1  ;;  %s2740_s18 = sphi %s2772_s18, %s15_s18  }
   0x2   : > { %p189_p1 = scmp.lt.s32.totalorder %s2740_s18, 3 }
   0x4   : > { %p190_p2 = pnand %p1971_p0, %p189_p1 }
   0x5   : > { %s1972_s15 = sshll.u32 (!%p190_p2), %s1967_s19, 2 }
   0x6   : > { %193 = sbr.rel (%p190_p2) target bundleno = 472 (0x1d8), region = 40  ;;  %p219_p3 = scmp.lt.s32.totalorder (!%p190_p2), %s1972_s15, 7 }
   0xb   : > { %v2575_v0 = vld [vmem:[%s3320_s1 + $0x38] sm:$0xff]  ;;  %v2574_v4 = vld [vmem:[%s3320_s1 + $0x30] sm:$0xff]  ;;  %v2573_v8 = vld [vmem:[%s3320_s1 + $0x28] sm:$0xff]  ;;  %s3326_s15 = smov (!%p219_p3, %s1972_s15), 7  ;;  %vm1883_vm0 = vcmask 1040384   ;;  %vm1876_vm1 = vcmask 408576  }
   0xc   : > { %v2583_v1 = vld [vmem:[%s3320_s1 + $0x78] sm:$0xff]  ;;  %1496 = vmatpush.bf16.msra.mxu0 %v2575_v0  ;;  %v2582_v5 = vld [vmem:[%s3320_s1 + $0x70] sm:$0xff]  ;;  %v2581_v9 = vld [vmem:[%s3320_s1 + $0x68] sm:$0xff]  ;;  %s2723_s12 = smul.u32 144, %s3326_s15  ;;  %s1975_s8 = sshll.u32 %s3326_s15, 3  ;;  %vm1906_vm2 = vcmask 80896  }
   0xd   : > { %v2591_v2 = vld [vmem:[%s3320_s1 + $0xb8] sm:$0xff]  ;;  %1515 = vmatpush.bf16.msra.mxu1 %v2583_v1  ;;  %v2590_v6 = vld [vmem:[%s3320_s1 + $0xb0] sm:$0xff]  ;;  %v2589_v10 = vld [vmem:[%s3320_s1 + $0xa8] sm:$0xff]  ;;  %s229_s13 = scalar_lea.vmem %s3324_s5, %s1975_s8 }
   0xe   : > { %v2599_v3 = vld [vmem:[%s3320_s1 + $0xf8] sm:$0xff]  ;;  %1534 = vmatpush.bf16.msra.mxu2 %v2591_v2  ;;  %v2598_v7 = vld [vmem:[%s3320_s1 + $0xf0] sm:$0xff]  ;;  %v2597_v11 = vld [vmem:[%s3320_s1 + $0xe8] sm:$0xff]  ;;  %s2858_s19 = scalar_lea.vmem %s3319_s0, %s2723_s12 }
   0xf   : > { %1553 = vmatpush.bf16.msra.mxu3 %v2599_v3  ;;  %v2572_v12 = vld [vmem:[%s3320_s1 + $0x20] sm:$0xff]  ;;  %v2571_v16 = vld [vmem:[%s3320_s1 + $0x18] sm:$0xff]  ;;  %v2570_v20 = vld [vmem:[%s3320_s1 + $0x10] sm:$0xff] }
  0x10   : > { %1497 = vmatpush.bf16.msra.mxu0 %v2574_v4  ;;  %v2580_v13 = vld [vmem:[%s3320_s1 + $0x60] sm:$0xff]  ;;  %v2579_v17 = vld [vmem:[%s3320_s1 + $0x58] sm:$0xff]  ;;  %v2578_v21 = vld [vmem:[%s3320_s1 + $0x50] sm:$0xff] }
  0x11   : > { %1516 = vmatpush.bf16.msra.mxu1 %v2582_v5  ;;  %v2588_v14 = vld [vmem:[%s3320_s1 + $0xa0] sm:$0xff]  ;;  %v2587_v18 = vld [vmem:[%s3320_s1 + $0x98] sm:$0xff]  ;;  %v2586_v22 = vld [vmem:[%s3320_s1 + $0x90] sm:$0xff] }
  0x12   : > { %1535 = vmatpush.bf16.msra.mxu2 %v2590_v6  ;;  %v2596_v15 = vld [vmem:[%s3320_s1 + $0xe0] sm:$0xff]  ;;  %v2595_v19 = vld [vmem:[%s3320_s1 + $0xd8] sm:$0xff]  ;;  %v2594_v23 = vld [vmem:[%s3320_s1 + $0xd0] sm:$0xff] }
  0x13   : > { %1554 = vmatpush.bf16.msra.mxu3 %v2598_v7  ;;  %v2569_v24 = vld [vmem:[%s3320_s1 + $0x8] sm:$0xff]  ;;  %v2568_v28 = vld [vmem:[%s3320_s1] sm:$0xff]  ;;  %v250_v33 = vld [vmem:[%s2858_s19 + $0x90] sm:$0xff] }
  0x14   : > { %1498 = vmatpush.bf16.msra.mxu0 %v2573_v8  ;;  %v2577_v25 = vld [vmem:[%s3320_s1 + $0x48] sm:$0xff]  ;;  %v2576_v29 = vld [vmem:[%s3320_s1 + $0x40] sm:$0xff]  ;;  %v251_v35 = vld [vmem:[%s2858_s19 + $0x98] sm:$0xff] }
  0x15   : > { %1517 = vmatpush.bf16.msra.mxu1 %v2581_v9  ;;  %v2585_v26 = vld [vmem:[%s3320_s1 + $0x88] sm:$0xff]  ;;  %v232_v30 = vld [vmem:[%s2858_s19] sm:$0xff]  ;;  %v234_v36 = vld [vmem:[%s2858_s19 + $0x10] sm:$0xff] }
  0x16   : > { %1536 = vmatpush.bf16.msra.mxu2 %v2589_v10  ;;  %v2593_v27 = vld [vmem:[%s3320_s1 + $0xc8] sm:$0xff]  ;;  %v2584_v31 = vld [vmem:[%s3320_s1 + $0x80] sm:$0xff]  ;;  %v235_v38 = vld [vmem:[%s2858_s19 + $0x18] sm:$0xff]  ;;  %v304_v42 = vpack.c.bf16 %v250_v33, %v232_v30 }
  0x17   : > { %1555 = vmatpush.bf16.msra.mxu3 %v2597_v11  ;;  %v2592_v32 = vld [vmem:[%s3320_s1 + $0xc0] sm:$0xff]  ;;  %v233_v34 = vld [vmem:[%s2858_s19 + $0x8] sm:$0xff]  ;;  %v2607_v40 = vld [vmem:[%s3320_s1 + $0x138] sm:$0xff] }
  0x18   : > { %1499 = vmatpush.bf16.msra.mxu0 %v2572_v12  ;;  %v252_v37 = vld [vmem:[%s2858_s19 + $0xa0] sm:$0xff]  ;;  %v253_v39 = vld [vmem:[%s2858_s19 + $0xa8] sm:$0xff]  ;;  %v2615_v41 = vld [vmem:[%s3320_s1 + $0x178] sm:$0xff]  ;;  %v305_v43 = vpack.c.bf16 %v251_v35, %v233_v34 }
  0x19   : > { %1518 = vmatpush.bf16.msra.mxu1 %v2580_v13  ;;  %v306_v44 = vpack.c.bf16 %v252_v37, %v234_v36  ;;  %v307_v45 = vpack.c.bf16 %v253_v39, %v235_v38  ;;  %v2623_v46 = vld [vmem:[%s3320_s1 + $0x1b8] sm:$0xff]  ;;  %v2606_v48 = vld [vmem:[%s3320_s1 + $0x130] sm:$0xff]  ;;  %v2605_v52 = vld [vmem:[%s3320_s1 + $0x128] sm:$0xff] }
  0x1a   : > { %1537 = vmatpush.bf16.msra.mxu2 %v2588_v14  ;;  %v2631_v47 = vld [vmem:[%s3320_s1 + $0x1f8] sm:$0xff]  ;;  %v2614_v49 = vld [vmem:[%s3320_s1 + $0x170] sm:$0xff]  ;;  %v2613_v53 = vld [vmem:[%s3320_s1 + $0x168] sm:$0xff] }
  0x1b   : > { %1556 = vmatpush.bf16.msra.mxu3 %v2596_v15  ;;  %v2622_v50 = vld [vmem:[%s3320_s1 + $0x1b0] sm:$0xff]  ;;  %v2621_v54 = vld [vmem:[%s3320_s1 + $0x1a8] sm:$0xff]  ;;  %v2604_v56 = vld [vmem:[%s3320_s1 + $0x120] sm:$0xff] }
  0x1c   : > { %1500 = vmatpush.bf16.msra.mxu0 %v2571_v16  ;;  %v2630_v51 = vld [vmem:[%s3320_s1 + $0x1f0] sm:$0xff]  ;;  %v2629_v55 = vld [vmem:[%s3320_s1 + $0x1e8] sm:$0xff]  ;;  %v2612_v57 = vld [vmem:[%s3320_s1 + $0x160] sm:$0xff] }
  0x1d   : > { %1519 = vmatpush.bf16.msra.mxu1 %v2579_v17  ;;  %v2620_v58 = vld [vmem:[%s3320_s1 + $0x1a0] sm:$0xff]  ;;  %v286_v61 = vld [vmem:[%s2858_s19 + $0x1b0] sm:$0xff]  ;;  %v269_v62 = vld [vmem:[%s2858_s19 + $0x128] sm:$0xff] }
  0x1e   : > { %1538 = vmatpush.bf16.msra.mxu2 %v2587_v18  ;;  %v2628_v59 = vld [vmem:[%s3320_s1 + $0x1e0] sm:$0xff]  ;;  %v287_v63 = vld [vmem:[%s2858_s19 + $0x1b8] sm:$0xff]  ;;  %v270_v0 = vld [vmem:[%s2858_s19 + $0x130] sm:$0xff] }
  0x1f   : > { %1557 = vmatpush.bf16.msra.mxu3 %v2595_v19  ;;  %v268_v60 = vld [vmem:[%s2858_s19 + $0x120] sm:$0xff]  ;;  %v271_v2 = vld [vmem:[%s2858_s19 + $0x138] sm:$0xff]  ;;  %v289_v3 = vld [vmem:[%s2858_s19 + $0x1c8] sm:$0xff]  ;;  %v323_v7 = vpack.c.bf16 %v287_v63, %v269_v62 }
  0x20   : > { %1501 = vmatpush.bf16.msra.mxu0 %v2570_v20  ;;  %v288_v1 = vld [vmem:[%s2858_s19 + $0x1c0] sm:$0xff]  ;;  %v2603_v4 = vld [vmem:[%s3320_s1 + $0x118] sm:$0xff]  ;;  %v322_v6 = vpack.c.bf16 %v286_v61, %v268_v60  ;;  %v325_v9 = vpack.c.bf16 %v289_v3, %v271_v2  ;;  %v2602_v12 = vld [vmem:[%s3320_s1 + $0x110] sm:$0xff] }
  0x21   : > { %1520 = vmatpush.bf16.msra.mxu1 %v2578_v21  ;;  %v2611_v5 = vld [vmem:[%s3320_s1 + $0x158] sm:$0xff]  ;;  %v324_v8 = vpack.c.bf16 %v288_v1, %v270_v0  ;;  %v2610_v13 = vld [vmem:[%s3320_s1 + $0x150] sm:$0xff]  ;;  %v2601_v16 = vld [vmem:[%s3320_s1 + $0x108] sm:$0xff] }
  0x22   : > { %1539 = vmatpush.bf16.msra.mxu2 %v2586_v22  ;;  %v2619_v10 = vld [vmem:[%s3320_s1 + $0x198] sm:$0xff]  ;;  %v2618_v14 = vld [vmem:[%s3320_s1 + $0x190] sm:$0xff]  ;;  %v2609_v17 = vld [vmem:[%s3320_s1 + $0x148] sm:$0xff] }
  0x23   : > { %1558 = vmatpush.bf16.msra.mxu3 %v2594_v23  ;;  %v2627_v11 = vld [vmem:[%s3320_s1 + $0x1d8] sm:$0xff]  ;;  %v2626_v15 = vld [vmem:[%s3320_s1 + $0x1d0] sm:$0xff]  ;;  %v2617_v18 = vld [vmem:[%s3320_s1 + $0x188] sm:$0xff] }
  0x24   : > { %1502 = vmatpush.bf16.msra.mxu0 %v2569_v24  ;;  %v2625_v19 = vld [vmem:[%s3320_s1 + $0x1c8] sm:$0xff]  ;;  %v2600_v20 = vld [vmem:[%s3320_s1 + $0x100] sm:$0xff]  ;;  %v238_v30 = vld [vmem:[%s2858_s19 + $0x30] sm:$0xff] }
  0x25   : > { %1521 = vmatpush.bf16.msra.mxu1 %v2577_v25  ;;  %v2608_v21 = vld [vmem:[%s3320_s1 + $0x140] sm:$0xff]  ;;  %v254_v25 = vld [vmem:[%s2858_s19 + $0xb0] sm:$0xff]  ;;  %v257_v33 = vld [vmem:[%s2858_s19 + $0xc8] sm:$0xff] }
  0x26   : > { %1540 = vmatpush.bf16.msra.mxu2 %v2585_v26  ;;  %v236_v22 = vld [vmem:[%s2858_s19 + $0x20] sm:$0xff]  ;;  %v2639_v26 = vld [vmem:[%s3320_s1 + $0x238] sm:$0xff] }
  0x27   : > { %1559 = vmatpush.bf16.msra.mxu3 %v2593_v27  ;;  %v2616_v23 = vld [vmem:[%s3320_s1 + $0x180] sm:$0xff]  ;;  %v2647_v27 = vld [vmem:[%s3320_s1 + $0x278] sm:$0xff]  ;;  %v308_v36 = vpack.c.bf16 %v254_v25, %v236_v22  ;;  %v242_v22 = vld [vmem:[%s2858_s19 + $0x50] sm:$0xff] }
  0x28   : > { %1503 = vmatpush.bf16.msra.mxu0 %v2568_v28  ;;  %v2624_v24 = vld [vmem:[%s3320_s1 + $0x1c0] sm:$0xff]  ;;  %v237_v28 = vld [vmem:[%s2858_s19 + $0x28] sm:$0xff]  ;;  %v2655_v34 = vld [vmem:[%s3320_s1 + $0x2b8] sm:$0xff] }
  0x29   : > { %1522 = vmatpush.bf16.msra.mxu1 %v2576_v29  ;;  %v255_v29 = vld [vmem:[%s2858_s19 + $0xb8] sm:$0xff]  ;;  %v260_v25 = vld [vmem:[%s2858_s19 + $0xe0] sm:$0xff] }
  0x2a   : > { %1541 = vmatpush.bf16.msra.mxu2 %v2584_v31  ;;  %v256_v31 = vld [vmem:[%s2858_s19 + $0xc0] sm:$0xff]  ;;  %v2663_v35 = vld [vmem:[%s3320_s1 + $0x2f8] sm:$0xff]  ;;  %v309_v37 = vpack.c.bf16 %v255_v29, %v237_v28 }
  0x2b   : > { %1560 = vmatpush.bf16.msra.mxu3 %v2592_v32  ;;  %1504 = vmatmul.bf16.vlgmr.msra.gmra.mxu0 %v304_v42  ;;  %v239_v32 = vld [vmem:[%s2858_s19 + $0x38] sm:$0xff]  ;;  %v310_v38 = vpack.c.bf16 %v256_v31, %v238_v30  ;;  %v2654_v42 = vld [vmem:[%s3320_s1 + $0x2b0] sm:$0xff]  ;;  %v314_v30 = vpack.c.bf16 %v260_v25, %v242_v22  ;;  %v2709_v25 = vld [vmem:[%s3320_s1 + $0x468] sm:$0xff] }
  0x2c   : > { %1572 = vmatpush.bf16.msrb.mxu0 %v2607_v40  ;;  %1523 = vmatmul.bf16.vlgmr.msra.gmra.mxu1 %v305_v43  ;;  %v311_v39 = vpack.c.bf16 %v257_v33, %v239_v32  ;;  %v2638_v40 = vld [vmem:[%s3320_s1 + $0x230] sm:$0xff]  ;;  %v2635_v60 = vld [vmem:[%s3320_s1 + $0x218] sm:$0xff] }
  0x2d   : > { %1591 = vmatpush.bf16.msrb.mxu1 %v2615_v41  ;;  %1542 = vmatmul.bf16.vlgmr.msra.gmra.mxu2 %v306_v44  ;;  %v2646_v41 = vld [vmem:[%s3320_s1 + $0x270] sm:$0xff]  ;;  %v2637_v44 = vld [vmem:[%s3320_s1 + $0x228] sm:$0xff]  ;;  %v2643_v61 = vld [vmem:[%s3320_s1 + $0x258] sm:$0xff] }
  0x2e   : > { %1561 = vmatmul.bf16.vlgmr.msra.gmra.mxu3 %v307_v45  ;;  %1610 = vmatpush.bf16.msrb.mxu2 %v2623_v46  ;;  %v2662_v43 = vld [vmem:[%s3320_s1 + $0x2f0] sm:$0xff]  ;;  %v2645_v45 = vld [vmem:[%s3320_s1 + $0x268] sm:$0xff]  ;;  %v2651_v62 = vld [vmem:[%s3320_s1 + $0x298] sm:$0xff] }
  0x2f   : > { %1629 = vmatpush.bf16.msrb.mxu3 %v2631_v47  ;;  %v2653_v46 = vld [vmem:[%s3320_s1 + $0x2a8] sm:$0xff]  ;;  %v2659_v63 = vld [vmem:[%s3320_s1 + $0x2d8] sm:$0xff]  ;;  %v2670_v32 = vld [vmem:[%s3320_s1 + $0x330] sm:$0xff] }
  0x30   : > { %1573 = vmatpush.bf16.msrb.mxu0 %v2606_v48  ;;  %v2661_v47 = vld [vmem:[%s3320_s1 + $0x2e8] sm:$0xff]  ;;  %v2636_v48 = vld [vmem:[%s3320_s1 + $0x220] sm:$0xff]  ;;  %v2678_v33 = vld [vmem:[%s3320_s1 + $0x370] sm:$0xff] }
  0x31   : > { %1592 = vmatpush.bf16.msrb.mxu1 %v2614_v49  ;;  %v2644_v49 = vld [vmem:[%s3320_s1 + $0x260] sm:$0xff]  ;;  %v2702_v22 = vld [vmem:[%s3320_s1 + $0x430] sm:$0xff] }
  0x32   : > { %1611 = vmatpush.bf16.msrb.mxu2 %v2622_v50  ;;  %v2652_v50 = vld [vmem:[%s3320_s1 + $0x2a0] sm:$0xff] }
  0x33   : > { %1630 = vmatpush.bf16.msrb.mxu3 %v2630_v51  ;;  %v2660_v51 = vld [vmem:[%s3320_s1 + $0x2e0] sm:$0xff] }
  0x34   : > { %1574 = vmatpush.bf16.msrb.mxu0 %v2605_v52  ;;  %v272_v52 = vld [vmem:[%s2858_s19 + $0x140] sm:$0xff] }
  0x35   : > { %1593 = vmatpush.bf16.msrb.mxu1 %v2613_v53  ;;  %v290_v53 = vld [vmem:[%s2858_s19 + $0x1d0] sm:$0xff] }
  0x36   : > { %1612 = vmatpush.bf16.msrb.mxu2 %v2621_v54  ;;  %v273_v54 = vld [vmem:[%s2858_s19 + $0x148] sm:$0xff]  ;;  %v326_v0 = vpack.c.bf16 %v290_v53, %v272_v52  ;;  %v2667_v52 = vld [vmem:[%s3320_s1 + $0x318] sm:$0xff] }
  0x37   : > { %1631 = vmatpush.bf16.msrb.mxu3 %v2629_v55  ;;  %v291_v55 = vld [vmem:[%s2858_s19 + $0x1d8] sm:$0xff] }
  0x38   : > { %1575 = vmatpush.bf16.msrb.mxu0 %v2604_v56  ;;  %v274_v56 = vld [vmem:[%s2858_s19 + $0x150] sm:$0xff]  ;;  %v327_v1 = vpack.c.bf16 %v291_v55, %v273_v54  ;;  %v2675_v53 = vld [vmem:[%s3320_s1 + $0x358] sm:$0xff] }
  0x39   : > { %1594 = vmatpush.bf16.msrb.mxu1 %v2612_v57  ;;  %v292_v57 = vld [vmem:[%s2858_s19 + $0x1e0] sm:$0xff]  ;;  %v2683_v54 = vld [vmem:[%s3320_s1 + $0x398] sm:$0xff] }
  0x3a   : > { %1613 = vmatpush.bf16.msrb.mxu2 %v2620_v58  ;;  %v275_v58 = vld [vmem:[%s2858_s19 + $0x158] sm:$0xff]  ;;  %v328_v2 = vpack.c.bf16 %v292_v57, %v274_v56 }
  0x3b   : > { %1632 = vmatpush.bf16.msrb.mxu3 %v2628_v59  ;;  %1509 = vmatmul.bf16.gmra.mxu0 %v322_v6  ;;  %v293_v59 = vld [vmem:[%s2858_s19 + $0x1e8] sm:$0xff]  ;;  %v2650_v6 = vld [vmem:[%s3320_s1 + $0x290] sm:$0xff]  ;;  %v2691_v55 = vld [vmem:[%s3320_s1 + $0x3d8] sm:$0xff] }
  0x3c   : > { %1576 = vmatpush.bf16.msrb.mxu0 %v2603_v4  ;;  %1528 = vmatmul.bf16.gmra.mxu1 %v323_v7  ;;  %v329_v3 = vpack.c.bf16 %v293_v59, %v275_v58  ;;  %v2634_v4 = vld [vmem:[%s3320_s1 + $0x210] sm:$0xff] }
  0x3d   : > { %1595 = vmatpush.bf16.msrb.mxu1 %v2611_v5  ;;  %1547 = vmatmul.bf16.gmra.mxu2 %v324_v8  ;;  %v2642_v5 = vld [vmem:[%s3320_s1 + $0x250] sm:$0xff]  ;;  %v2633_v8 = vld [vmem:[%s3320_s1 + $0x208] sm:$0xff] }
  0x3e   : > { %1566 = vmatmul.bf16.gmra.mxu3 %v325_v9  ;;  %1614 = vmatpush.bf16.msrb.mxu2 %v2619_v10  ;;  %v2658_v7 = vld [vmem:[%s3320_s1 + $0x2d0] sm:$0xff]  ;;  %v2641_v9 = vld [vmem:[%s3320_s1 + $0x248] sm:$0xff] }
  0x3f   : > { %1633 = vmatpush.bf16.msrb.mxu3 %v2627_v11  ;;  %v2649_v10 = vld [vmem:[%s3320_s1 + $0x288] sm:$0xff] }
  0x40   : > { %1577 = vmatpush.bf16.msrb.mxu0 %v2602_v12  ;;  %v2657_v11 = vld [vmem:[%s3320_s1 + $0x2c8] sm:$0xff]  ;;  %v2632_v12 = vld [vmem:[%s3320_s1 + $0x200] sm:$0xff] }
  0x41   : > { %1596 = vmatpush.bf16.msrb.mxu1 %v2610_v13  ;;  %v2640_v13 = vld [vmem:[%s3320_s1 + $0x240] sm:$0xff] }
  0x42   : > { %1615 = vmatpush.bf16.msrb.mxu2 %v2618_v14  ;;  %v2648_v14 = vld [vmem:[%s3320_s1 + $0x280] sm:$0xff] }
  0x43   : > { %1634 = vmatpush.bf16.msrb.mxu3 %v2626_v15  ;;  %v2656_v15 = vld [vmem:[%s3320_s1 + $0x2c0] sm:$0xff] }
  0x44   : > { %1578 = vmatpush.bf16.msrb.mxu0 %v2601_v16  ;;  %v240_v16 = vld [vmem:[%s2858_s19 + $0x40] sm:$0xff] }
  0x45   : > { %1597 = vmatpush.bf16.msrb.mxu1 %v2609_v17  ;;  %v258_v17 = vld [vmem:[%s2858_s19 + $0xd0] sm:$0xff] }
  0x46   : > { %1616 = vmatpush.bf16.msrb.mxu2 %v2617_v18  ;;  %v241_v18 = vld [vmem:[%s2858_s19 + $0x48] sm:$0xff]  ;;  %v312_v28 = vpack.c.bf16 %v258_v17, %v240_v16  ;;  %v247_v16 = vld [vmem:[%s2858_s19 + $0x78] sm:$0xff] }
  0x47   : > { %1635 = vmatpush.bf16.msrb.mxu3 %v2625_v19  ;;  %v259_v19 = vld [vmem:[%s2858_s19 + $0xd8] sm:$0xff]  ;;  %v265_v17 = vld [vmem:[%s2858_s19 + $0x108] sm:$0xff] }
  0x48   : > { %1579 = vmatpush.bf16.msrb.mxu0 %v2600_v20  ;;  %v2671_v20 = vld [vmem:[%s3320_s1 + $0x338] sm:$0xff]  ;;  %v313_v29 = vpack.c.bf16 %v259_v19, %v241_v18 }
  0x49   : > { %1598 = vmatpush.bf16.msrb.mxu1 %v2608_v21  ;;  %v2679_v21 = vld [vmem:[%s3320_s1 + $0x378] sm:$0xff] }
  0x4a   : > { %1617 = vmatpush.bf16.msrb.mxu2 %v2616_v23  ;;  %v2687_v23 = vld [vmem:[%s3320_s1 + $0x3b8] sm:$0xff] }
  0x4b   : > { %1636 = vmatpush.bf16.msrb.mxu3 %v2624_v24  ;;  %1580 = vmatmul.bf16.vlgmr.msrb.gmra.mxu0 %v308_v36  ;;  %v2695_v24 = vld [vmem:[%s3320_s1 + $0x3f8] sm:$0xff]  ;;  %v2669_v36 = vld [vmem:[%s3320_s1 + $0x328] sm:$0xff] }
  0x4c   : > { %1648 = vmatpush.bf16.msra.mxu0 %v2639_v26  ;;  %1599 = vmatmul.bf16.vlgmr.msrb.gmra.mxu1 %v309_v37  ;;  %v243_v26 = vld [vmem:[%s2858_s19 + $0x58] sm:$0xff]  ;;  %v2677_v37 = vld [vmem:[%s3320_s1 + $0x368] sm:$0xff] }
  0x4d   : > { %1667 = vmatpush.bf16.msra.mxu1 %v2647_v27  ;;  %1618 = vmatmul.bf16.vlgmr.msrb.gmra.mxu2 %v310_v38  ;;  %v261_v27 = vld [vmem:[%s2858_s19 + $0xe8] sm:$0xff] }
  0x4e   : > { %1686 = vmatpush.bf16.msra.mxu2 %v2655_v34  ;;  %1637 = vmatmul.bf16.vlgmr.msrb.gmra.mxu3 %v311_v39  ;;  %v315_v31 = vpack.c.bf16 %v261_v27, %v243_v26  ;;  %v2686_v34 = vld [vmem:[%s3320_s1 + $0x3b0] sm:$0xff]  ;;  %v2685_v38 = vld [vmem:[%s3320_s1 + $0x3a8] sm:$0xff]  ;;  %v2700_v26 = vld [vmem:[%s3320_s1 + $0x420] sm:$0xff] }
  0x4f   : > { %1705 = vmatpush.bf16.msra.mxu3 %v2663_v35  ;;  %v2694_v35 = vld [vmem:[%s3320_s1 + $0x3f0] sm:$0xff]  ;;  %v2693_v39 = vld [vmem:[%s3320_s1 + $0x3e8] sm:$0xff]  ;;  %v2708_v27 = vld [vmem:[%s3320_s1 + $0x460] sm:$0xff] }
  0x50   : > { %1649 = vmatpush.bf16.msra.mxu0 %v2638_v40  ;;  %v2668_v40 = vld [vmem:[%s3320_s1 + $0x320] sm:$0xff] }
  0x51   : > { %1668 = vmatpush.bf16.msra.mxu1 %v2646_v41  ;;  %v2676_v41 = vld [vmem:[%s3320_s1 + $0x360] sm:$0xff] }
  0x52   : > { %1687 = vmatpush.bf16.msra.mxu2 %v2654_v42  ;;  %v2684_v42 = vld [vmem:[%s3320_s1 + $0x3a0] sm:$0xff] }
  0x53   : > { %1706 = vmatpush.bf16.msra.mxu3 %v2662_v43  ;;  %v2692_v43 = vld [vmem:[%s3320_s1 + $0x3e0] sm:$0xff] }
  0x54   : > { %1650 = vmatpush.bf16.msra.mxu0 %v2637_v44  ;;  %v276_v44 = vld [vmem:[%s2858_s19 + $0x160] sm:$0xff] }
  0x55   : > { %1669 = vmatpush.bf16.msra.mxu1 %v2645_v45  ;;  %v294_v45 = vld [vmem:[%s2858_s19 + $0x1f0] sm:$0xff] }
  0x56   : > { %1688 = vmatpush.bf16.msra.mxu2 %v2653_v46  ;;  %v277_v46 = vld [vmem:[%s2858_s19 + $0x168] sm:$0xff]  ;;  %v330_v56 = vpack.c.bf16 %v294_v45, %v276_v44 }
  0x57   : > { %1707 = vmatpush.bf16.msra.mxu3 %v2661_v47  ;;  %v295_v47 = vld [vmem:[%s2858_s19 + $0x1f8] sm:$0xff]  ;;  %v2697_v44 = vld [vmem:[%s3320_s1 + $0x408] sm:$0xff] }
  0x58   : > { %1651 = vmatpush.bf16.msra.mxu0 %v2636_v48  ;;  %v278_v48 = vld [vmem:[%s2858_s19 + $0x170] sm:$0xff]  ;;  %v331_v57 = vpack.c.bf16 %v295_v47, %v277_v46  ;;  %v2705_v45 = vld [vmem:[%s3320_s1 + $0x448] sm:$0xff]  ;;  %v2696_v46 = vld [vmem:[%s3320_s1 + $0x400] sm:$0xff] }
  0x59   : > { %1670 = vmatpush.bf16.msra.mxu1 %v2644_v49  ;;  %v296_v49 = vld [vmem:[%s2858_s19 + $0x200] sm:$0xff] }
  0x5a   : > { %1689 = vmatpush.bf16.msra.mxu2 %v2652_v50  ;;  %v279_v50 = vld [vmem:[%s2858_s19 + $0x178] sm:$0xff]  ;;  %v332_v58 = vpack.c.bf16 %v296_v49, %v278_v48  ;;  %v2704_v47 = vld [vmem:[%s3320_s1 + $0x440] sm:$0xff]  ;;  %v266_v49 = vld [vmem:[%s2858_s19 + $0x110] sm:$0xff] }
  0x5b   : > { %1708 = vmatpush.bf16.msra.mxu3 %v2660_v51  ;;  %1585 = vmatmul.bf16.gmra.mxu0 %v326_v0  ;;  %v297_v51 = vld [vmem:[%s2858_s19 + $0x208] sm:$0xff]  ;;  %v248_v48 = vld [vmem:[%s2858_s19 + $0x80] sm:$0xff] }
  0x5c   : > { %1652 = vmatpush.bf16.msra.mxu0 %v2635_v60  ;;  %1604 = vmatmul.bf16.gmra.mxu1 %v327_v1  ;;  %v333_v59 = vpack.c.bf16 %v297_v51, %v279_v50  ;;  %v2666_v60 = vld [vmem:[%s3320_s1 + $0x310] sm:$0xff]  ;;  %v2665_v0 = vld [vmem:[%s3320_s1 + $0x308] sm:$0xff]  ;;  %v267_v51 = vld [vmem:[%s2858_s19 + $0x118] sm:$0xff] }
  0x5d   : > { %1671 = vmatpush.bf16.msra.mxu1 %v2643_v61  ;;  %1623 = vmatmul.bf16.gmra.mxu2 %v328_v2  ;;  %v2674_v61 = vld [vmem:[%s3320_s1 + $0x350] sm:$0xff]  ;;  %v2673_v1 = vld [vmem:[%s3320_s1 + $0x348] sm:$0xff] }
  0x5e   : > { %1690 = vmatpush.bf16.msra.mxu2 %v2651_v62  ;;  %1642 = vmatmul.bf16.gmra.mxu3 %v329_v3  ;;  %v2682_v62 = vld [vmem:[%s3320_s1 + $0x390] sm:$0xff]  ;;  %v2681_v2 = vld [vmem:[%s3320_s1 + $0x388] sm:$0xff] }
  0x5f   : > { %1709 = vmatpush.bf16.msra.mxu3 %v2659_v63  ;;  %v2690_v63 = vld [vmem:[%s3320_s1 + $0x3d0] sm:$0xff]  ;;  %v2689_v3 = vld [vmem:[%s3320_s1 + $0x3c8] sm:$0xff] }
  0x60   : > { %1653 = vmatpush.bf16.msra.mxu0 %v2634_v4  ;;  %v2664_v4 = vld [vmem:[%s3320_s1 + $0x300] sm:$0xff]  ;;  %v249_v50 = vld [vmem:[%s2858_s19 + $0x88] sm:$0xff] }
  0x61   : > { %1672 = vmatpush.bf16.msra.mxu1 %v2642_v5  ;;  %v2672_v5 = vld [vmem:[%s3320_s1 + $0x340] sm:$0xff] }
  0x62   : > { %1691 = vmatpush.bf16.msra.mxu2 %v2650_v6  ;;  %v2680_v6 = vld [vmem:[%s3320_s1 + $0x380] sm:$0xff] }
  0x63   : > { %1710 = vmatpush.bf16.msra.mxu3 %v2658_v7  ;;  %v2688_v7 = vld [vmem:[%s3320_s1 + $0x3c0] sm:$0xff] }
  0x64   : > { %1654 = vmatpush.bf16.msra.mxu0 %v2633_v8  ;;  %v244_v8 = vld [vmem:[%s2858_s19 + $0x60] sm:$0xff] }
  0x65   : > { %1673 = vmatpush.bf16.msra.mxu1 %v2641_v9  ;;  %v262_v9 = vld [vmem:[%s2858_s19 + $0xf0] sm:$0xff] }
  0x66   : > { %1692 = vmatpush.bf16.msra.mxu2 %v2649_v10  ;;  %v245_v10 = vld [vmem:[%s2858_s19 + $0x68] sm:$0xff]  ;;  %v316_v18 = vpack.c.bf16 %v262_v9, %v244_v8 }
  0x67   : > { %1711 = vmatpush.bf16.msra.mxu3 %v2657_v11  ;;  %v2703_v11 = vld [vmem:[%s3320_s1 + $0x438] sm:$0xff] }
  0x68   : > { %1655 = vmatpush.bf16.msra.mxu0 %v2632_v12  ;;  %v263_v12 = vld [vmem:[%s2858_s19 + $0xf8] sm:$0xff] }
  0x69   : > { %1674 = vmatpush.bf16.msra.mxu1 %v2640_v13  ;;  %v246_v13 = vld [vmem:[%s2858_s19 + $0x70] sm:$0xff]  ;;  %v317_v19 = vpack.c.bf16 %v263_v12, %v245_v10 }
  0x6a   : > { %1693 = vmatpush.bf16.msra.mxu2 %v2648_v14  ;;  %v2711_v14 = vld [vmem:[%s3320_s1 + $0x478] sm:$0xff] }
  0x6b   : > { %1712 = vmatpush.bf16.msra.mxu3 %v2656_v15  ;;  %1656 = vmatmul.bf16.vlgmr.msra.gmra.mxu0 %v312_v28  ;;  %v264_v15 = vld [vmem:[%s2858_s19 + $0x100] sm:$0xff] }
  0x6c   : > { %1724 = vmatpush.bf16.msrb.mxu0 %v2671_v20  ;;  %1675 = vmatmul.bf16.vlgmr.msra.gmra.mxu1 %v313_v29  ;;  %v318_v20 = vpack.c.bf16 %v264_v15, %v246_v13  ;;  %v280_v28 = vld [vmem:[%s2858_s19 + $0x180] sm:$0xff]  ;;  %v298_v29 = vld [vmem:[%s2858_s19 + $0x210] sm:$0xff] }
  0x6d   : > { %1743 = vmatpush.bf16.msrb.mxu1 %v2679_v21  ;;  %1694 = vmatmul.bf16.vlgmr.msra.gmra.mxu2 %v314_v30  ;;  %v319_v21 = vpack.c.bf16 %v265_v17, %v247_v16  ;;  %v281_v30 = vld [vmem:[%s2858_s19 + $0x188] sm:$0xff] }
  0x6e   : > { %1762 = vmatpush.bf16.msrb.mxu2 %v2687_v23  ;;  %1713 = vmatmul.bf16.vlgmr.msra.gmra.mxu3 %v315_v31  ;;  %v2710_v23 = vld [vmem:[%s3320_s1 + $0x470] sm:$0xff]  ;;  %v299_v31 = vld [vmem:[%s2858_s19 + $0x218] sm:$0xff] }
  0x6f   : > { %1781 = vmatpush.bf16.msrb.mxu3 %v2695_v24  ;;  %v2701_v24 = vld [vmem:[%s3320_s1 + $0x428] sm:$0xff] }
  0x70   : > { %1725 = vmatpush.bf16.msrb.mxu0 %v2670_v32  ;;  %v282_v32 = vld [vmem:[%s2858_s19 + $0x190] sm:$0xff] }
  0x71   : > { %1744 = vmatpush.bf16.msrb.mxu1 %v2678_v33  ;;  %v300_v33 = vld [vmem:[%s2858_s19 + $0x220] sm:$0xff] }
  0x72   : > { %1763 = vmatpush.bf16.msrb.mxu2 %v2686_v34  ;;  %v283_v34 = vld [vmem:[%s2858_s19 + $0x198] sm:$0xff] }
  0x73   : > { %1782 = vmatpush.bf16.msrb.mxu3 %v2694_v35  ;;  %v301_v35 = vld [vmem:[%s2858_s19 + $0x228] sm:$0xff] }
  0x74   : > { %1726 = vmatpush.bf16.msrb.mxu0 %v2669_v36  ;;  %v2699_v36 = vld [vmem:[%s3320_s1 + $0x418] sm:$0xff] }
  0x75   : > { %1745 = vmatpush.bf16.msrb.mxu1 %v2677_v37  ;;  %v2707_v37 = vld [vmem:[%s3320_s1 + $0x458] sm:$0xff] }
  0x76   : > { %1764 = vmatpush.bf16.msrb.mxu2 %v2685_v38  ;;  %v334_v38 = vpack.c.bf16 %v298_v29, %v280_v28 }
  0x77   : > { %1783 = vmatpush.bf16.msrb.mxu3 %v2693_v39  ;;  %v335_v39 = vpack.c.bf16 %v299_v31, %v281_v30 }
  0x78   : > { %1727 = vmatpush.bf16.msrb.mxu0 %v2668_v40  ;;  %v336_v40 = vpack.c.bf16 %v300_v33, %v282_v32 }
  0x79   : > { %1746 = vmatpush.bf16.msrb.mxu1 %v2676_v41  ;;  %v337_v41 = vpack.c.bf16 %v301_v35, %v283_v34 }
  0x7a   : > { %1765 = vmatpush.bf16.msrb.mxu2 %v2684_v42  ;;  %v2698_v42 = vld [vmem:[%s3320_s1 + $0x410] sm:$0xff] }
  0x7b   : > { %1784 = vmatpush.bf16.msrb.mxu3 %v2692_v43  ;;  %1661 = vmatmul.bf16.gmra.mxu0 %v330_v56  ;;  %v2706_v43 = vld [vmem:[%s3320_s1 + $0x450] sm:$0xff]  ;;  %v321_v56 = vpack.c.bf16 %v267_v51, %v249_v50 }
  0x7c   : > { %1728 = vmatpush.bf16.msrb.mxu0 %v2667_v52  ;;  %1680 = vmatmul.bf16.gmra.mxu1 %v331_v57  ;;  %v2732_v52 = vld [vmem:[%s3321_s2] ss:$0 sm:$0xff] }
  0x7d   : > { %1747 = vmatpush.bf16.msrb.mxu1 %v2675_v53  ;;  %1699 = vmatmul.bf16.gmra.mxu2 %v332_v58  ;;  %v284_v53 = vld [vmem:[%s2858_s19 + $0x1a0] sm:$0xff] }
  0x7e   : > { %1766 = vmatpush.bf16.msrb.mxu2 %v2683_v54  ;;  %1718 = vmatmul.bf16.gmra.mxu3 %v333_v59  ;;  %v302_v54 = vld [vmem:[%s2858_s19 + $0x230] sm:$0xff] }
  0x7f   : > { %1785 = vmatpush.bf16.msrb.mxu3 %v2691_v55  ;;  %v320_v55 = vpack.c.bf16 %v266_v49, %v248_v48  ;;  %v338_v59 = vpack.c.bf16 %v302_v54, %v284_v53 }
  0x80   : > { %1729 = vmatpush.bf16.msrb.mxu0 %v2666_v60 }
  0x81   : > { %1748 = vmatpush.bf16.msrb.mxu1 %v2674_v61 }
  0x82   : > { %1767 = vmatpush.bf16.msrb.mxu2 %v2682_v62 }
  0x83   : > { %1786 = vmatpush.bf16.msrb.mxu3 %v2690_v63 }
  0x84   : > { %1730 = vmatpush.bf16.msrb.mxu0 %v2665_v0 }
  0x85   : > { %1749 = vmatpush.bf16.msrb.mxu1 %v2673_v1 }
  0x86   : > { %1768 = vmatpush.bf16.msrb.mxu2 %v2681_v2 }
  0x87   : > { %1787 = vmatpush.bf16.msrb.mxu3 %v2689_v3 }
  0x88   : > { %1731 = vmatpush.bf16.msrb.mxu0 %v2664_v4 }
  0x89   : > { %1750 = vmatpush.bf16.msrb.mxu1 %v2672_v5 }
  0x8a   : > { %1769 = vmatpush.bf16.msrb.mxu2 %v2680_v6  ;;  %v285_v6 = vld [vmem:[%s2858_s19 + $0x1a8] sm:$0xff] }
  0x8b   : > { %1788 = vmatpush.bf16.msrb.mxu3 %v2688_v7  ;;  %1732 = vmatmul.bf16.vlgmr.msrb.gmra.mxu0 %v316_v18  ;;  %v303_v7 = vld [vmem:[%s2858_s19 + $0x238] sm:$0xff] }
  0x8c   : > { %1800 = vmatpush.bf16.msra.mxu0 %v2703_v11  ;;  %1751 = vmatmul.bf16.vlgmr.msrb.gmra.mxu1 %v317_v19  ;;  %v339_v10 = vpack.c.bf16 %v303_v7, %v285_v6 }
  0x8d   : > { %1819 = vmatpush.bf16.msra.mxu1 %v2711_v14  ;;  %1770 = vmatmul.bf16.vlgmr.msrb.gmra.mxu2 %v318_v20 }
  0x8e   : > { %1789 = vmatmul.bf16.vlgmr.msrb.gmra.mxu3 %v319_v21 }
  0x8f   : > { %2715 = vmatpush.bf16.msra.mxu3 %v2703_v11 }
  0x90   : > { %1801 = vmatpush.bf16.msra.mxu0 %v2702_v22 }
  0x91   : > { %1820 = vmatpush.bf16.msra.mxu1 %v2710_v23 }
  0x93   : > { %2716 = vmatpush.bf16.msra.mxu3 %v2702_v22 }
  0x94   : > { %1802 = vmatpush.bf16.msra.mxu0 %v2701_v24 }
  0x95   : > { %1821 = vmatpush.bf16.msra.mxu1 %v2709_v25 }
  0x97   : > { %2717 = vmatpush.bf16.msra.mxu3 %v2701_v24 }
  0x98   : > { %1803 = vmatpush.bf16.msra.mxu0 %v2700_v26 }
  0x99   : > { %1822 = vmatpush.bf16.msra.mxu1 %v2708_v27 }
  0x9b   : > { %2718 = vmatpush.bf16.msra.mxu3 %v2700_v26  ;;  %1737 = vmatmul.bf16.gmra.mxu0 %v334_v38 }
  0x9c   : > { %1804 = vmatpush.bf16.msra.mxu0 %v2699_v36  ;;  %1756 = vmatmul.bf16.gmra.mxu1 %v335_v39 }
  0x9d   : > { %1823 = vmatpush.bf16.msra.mxu1 %v2707_v37  ;;  %1775 = vmatmul.bf16.gmra.mxu2 %v336_v40 }
  0x9e   : > { %1794 = vmatmul.bf16.gmra.mxu3 %v337_v41 }
  0x9f   : > { %2719 = vmatpush.bf16.msra.mxu3 %v2699_v36 }
  0xa0   : > { %1805 = vmatpush.bf16.msra.mxu0 %v2698_v42 }
  0xa1   : > { %1824 = vmatpush.bf16.msra.mxu1 %v2706_v43 }
  0xa3   : > { %2720 = vmatpush.bf16.msra.mxu3 %v2698_v42 }
  0xa4   : > { %1806 = vmatpush.bf16.msra.mxu0 %v2697_v44 }
  0xa5   : > { %1825 = vmatpush.bf16.msra.mxu1 %v2705_v45 }
  0xa7   : > { %2721 = vmatpush.bf16.msra.mxu3 %v2697_v44 }
  0xa8   : > { %1807 = vmatpush.bf16.msra.mxu0 %v2696_v46  ;;  %v1505_v57 = vpop.f32.mrf.mxu0 }
  0xa9   : > { %1826 = vmatpush.bf16.msra.mxu1 %v2704_v47  ;;  %v1524_v58 = vpop.f32.mrf.mxu1  ;;  %v1506_v60 = vadd.f32 %v2732_v52, %v1505_v57 }
  0xab   : > { %2722 = vmatpush.bf16.msra.mxu3 %v2696_v46  ;;  %v1525_v61 = vadd.f32 %v1524_v58, %v1506_v60  ;;  %1808 = vmatmul.bf16.vlgmr.msra.gmra.mxu0 %v320_v55 }
  0xac   : > { %1827 = vmatmul.bf16.vlgmr.msra.gmra.mxu1 %v321_v56 }
  0xae   : > { %1813 = vmatmul.bf16.vlgmr.msra.gmra.mxu3 %v338_v59 }
  0xb0   : > { %v1543_v62 = vpop.f32.mrf.mxu2  ;;  %v1507_v1 = vpop.f32.mrf.mxu0 }
  0xb1   : > { %v1562_v63 = vpop.f32.mrf.mxu3  ;;  %v1544_v0 = vadd.f32 %v1543_v62, %v1525_v61  ;;  %v1526_v2 = vpop.f32.mrf.mxu1  ;;  %v1508_v3 = vadd.f32 %v2732_v52, %v1507_v1 }
  0xb3   : > { %v1563_v4 = vadd.f32 %v1562_v63, %v1544_v0  ;;  %v1527_v5 = vadd.f32 %v1526_v2, %v1508_v3  ;;  %v1850_v3 = vld [vmem:[%s3322_s3 + $0x18] sm:$0x1] }
  0xb8   : > { %v1545_v8 = vpop.f32.mrf.mxu2  ;;  %v1510_v12 = vpop.f32.mrf.mxu0 }
  0xb9   : > { %v1564_v9 = vpop.f32.mrf.mxu3  ;;  %v1546_v11 = vadd.f32 %v1545_v8, %v1527_v5  ;;  %v1529_v13 = vpop.f32.mrf.mxu1  ;;  %v1511_v14 = vadd.f32 %v2732_v52, %v1510_v12 }
  0xbb   : > { %v1565_v15 = vadd.f32 %v1564_v9, %v1546_v11  ;;  %v1530_v16 = vadd.f32 %v1529_v13, %v1511_v14  ;;  %v2714_v11 = vld [vmem:[%s3322_s3 + $0x10] sm:$0xff] }
  0xbc   : > { %1832 = vmatmul.bf16.gmra.mxu1 %v339_v10 }
  0xc0   : > { %v1548_v17 = vpop.f32.mrf.mxu2  ;;  %v1512_v20 = vpop.f32.mrf.mxu0 }
  0xc1   : > { %v1567_v18 = vpop.f32.mrf.mxu3  ;;  %v1549_v19 = vadd.f32 %v1548_v17, %v1530_v16  ;;  %v1531_v21 = vpop.f32.mrf.mxu1  ;;  %v1513_v22 = vadd.f32 %v2732_v52, %v1512_v20  ;;  %v2713_v16 = vld [vmem:[%s3322_s3 + $0x8] sm:$0xff] }
  0xc3   : > { %v1568_v23 = vadd.f32 %v1567_v18, %v1549_v19  ;;  %v1532_v24 = vadd.f32 %v1531_v21, %v1513_v22  ;;  %v2712_v22 = vld [vmem:[%s3322_s3] sm:$0xff] }
  0xc8   : > { %v1550_v25 = vpop.f32.mrf.mxu2  ;;  %v1581_v28 = vpop.f32.mrf.mxu0 }
  0xc9   : > { %v1569_v26 = vpop.f32.mrf.mxu3  ;;  %v1551_v27 = vadd.f32 %v1550_v25, %v1532_v24  ;;  %v1600_v29 = vpop.f32.mrf.mxu1  ;;  %v1582_v30 = vadd.f32 %v1581_v28, %v1563_v4  ;;  %v1868_v4 = vunpack.c.l.b16 %v1850_v3 }
  0xcb   : > { %v1570_v31 = vadd.f32 %v1569_v26, %v1551_v27  ;;  %v1601_v32 = vadd.f32 %v1600_v29, %v1582_v30  ;;  %v1872_v5 = vpack.c.b16 %v1868_v4, %v1868_v4 }
  0xcd   : > { %v1885_v9 = vsel %vm1883_vm0, %v1872_v5, 0 }
  0xce   : > { %1891 = vmatpush.bf16.msra.mxu2 %v1885_v9 }
  0xd0   : > { %v1619_v33 = vpop.f32.mrf.mxu2  ;;  %v1583_v36 = vpop.f32.mrf.mxu0 }
  0xd1   : > { %v1638_v34 = vpop.f32.mrf.mxu3  ;;  %v1620_v35 = vadd.f32 %v1619_v33, %v1601_v32  ;;  %v1602_v37 = vpop.f32.mrf.mxu1  ;;  %v1584_v38 = vadd.f32 %v1583_v36, %v1565_v15 }
  0xd2   : > { %1892 = vmatpush.bf16.msra.mxu2 %v2714_v11 }
  0xd3   : > { %v1639_v39 = vadd.f32 %v1638_v34, %v1620_v35  ;;  %v1603_v40 = vadd.f32 %v1602_v37, %v1584_v38 }
  0xd6   : > { %1893 = vmatpush.bf16.msra.mxu2 %v2713_v16 }
  0xd8   : > { %v1621_v41 = vpop.f32.mrf.mxu2  ;;  %v1586_v43 = vpop.f32.mrf.mxu0 }
  0xd9   : > { %v1640_v42 = vpop.f32.mrf.mxu3  ;;  %v1605_v44 = vpop.f32.mrf.mxu1  ;;  %v1587_v45 = vadd.f32 %v1586_v43, %v1568_v23  ;;  %v1622_v20 = vadd.f32 %v1621_v41, %v1603_v40 }
  0xda   : > { %1894 = vmatpush.bf16.msra.mxu2 %v2712_v22 }
  0xdb   : > { %v1606_v46 = vadd.f32 %v1605_v44, %v1587_v45  ;;  %v1641_v23 = vadd.f32 %v1640_v42, %v1622_v20 }
  0xe0   : > { %v1624_v47 = vpop.f32.mrf.mxu2  ;;  %v1588_v50 = vpop.f32.mrf.mxu0 }
  0xe1   : > { %v1643_v48 = vpop.f32.mrf.mxu3  ;;  %v1625_v49 = vadd.f32 %v1624_v47, %v1606_v46  ;;  %v1607_v51 = vpop.f32.mrf.mxu1  ;;  %v1589_v52 = vadd.f32 %v1588_v50, %v1570_v31 }
  0xe3   : > { %v1644_v53 = vadd.f32 %v1643_v48, %v1625_v49  ;;  %v1608_v54 = vadd.f32 %v1607_v51, %v1589_v52 }
  0xe8   : > { %v1626_v55 = vpop.f32.mrf.mxu2  ;;  %v1657_v57 = vpop.f32.mrf.mxu0 }
  0xe9   : > { %v1645_v56 = vpop.f32.mrf.mxu3  ;;  %v1676_v58 = vpop.f32.mrf.mxu1  ;;  %v1658_v21 = vadd.f32 %v1657_v57, %v1639_v39  ;;  %v1627_v37 = vadd.f32 %v1626_v55, %v1608_v54 }
  0xeb   : > { %v1677_v28 = vadd.f32 %v1676_v58, %v1658_v21  ;;  %v1646_v41 = vadd.f32 %v1645_v56, %v1627_v37 }
  0xf0   : > { %v1695_v59 = vpop.f32.mrf.mxu2  ;;  %v1659_v61 = vpop.f32.mrf.mxu0 }
  0xf1   : > { %v1714_v60 = vpop.f32.mrf.mxu3  ;;  %v1678_v62 = vpop.f32.mrf.mxu1  ;;  %v1660_v29 = vadd.f32 %v1659_v61, %v1641_v23  ;;  %v1696_v30 = vadd.f32 %v1695_v59, %v1677_v28 }
  0xf3   : > { %v1679_v31 = vadd.f32 %v1678_v62, %v1660_v29  ;;  %v1715_v32 = vadd.f32 %v1714_v60, %v1696_v30 }
  0xf8   : > { %v1662_v0 = vpop.f32.mrf.mxu0  ;;  %v1697_v2 = vpop.f32.mrf.mxu2 }
  0xf9   : > { %v1716_v63 = vpop.f32.mrf.mxu3  ;;  %v1681_v1 = vpop.f32.mrf.mxu1  ;;  %v1698_v33 = vadd.f32 %v1697_v2, %v1679_v31  ;;  %v1663_v42 = vadd.f32 %v1662_v0, %v1644_v53 }
  0xfb   : > { %v1717_v40 = vadd.f32 %v1716_v63, %v1698_v33  ;;  %v1682_v50 = vadd.f32 %v1681_v1, %v1663_v42 }
 0x100   : > { %v1664_v7 = vpop.f32.mrf.mxu0  ;;  %v1700_v10 = vpop.f32.mrf.mxu2 }
 0x101   : > { %v1719_v6 = vpop.f32.mrf.mxu3  ;;  %v1683_v8 = vpop.f32.mrf.mxu1  ;;  %v1665_v45 = vadd.f32 %v1664_v7, %v1646_v41  ;;  %v1701_v52 = vadd.f32 %v1700_v10, %v1682_v50 }
 0x103   : > { %v1684_v57 = vadd.f32 %v1683_v8, %v1665_v45  ;;  %v1720_v61 = vadd.f32 %v1719_v6, %v1701_v52 }
 0x108   : > { %v1733_v13 = vpop.f32.mrf.mxu0  ;;  %v1702_v15 = vpop.f32.mrf.mxu2 }
 0x109   : > { %v1721_v12 = vpop.f32.mrf.mxu3  ;;  %v1752_v14 = vpop.f32.mrf.mxu1  ;;  %v1734_v38 = vadd.f32 %v1733_v13, %v1715_v32  ;;  %v1703_v54 = vadd.f32 %v1702_v15, %v1684_v57 }
 0x10b   : > { %v1753_v43 = vadd.f32 %v1752_v14, %v1734_v38  ;;  %v1722_v63 = vadd.f32 %v1721_v12, %v1703_v54 }
 0x110   : > { %v1735_v18 = vpop.f32.mrf.mxu0  ;;  %v1771_v24 = vpop.f32.mrf.mxu2 }
 0x111   : > { %v1790_v17 = vpop.f32.mrf.mxu3  ;;  %v1754_v19 = vpop.f32.mrf.mxu1  ;;  %v1736_v44 = vadd.f32 %v1735_v18, %v1717_v40  ;;  %v1772_v46 = vadd.f32 %v1771_v24, %v1753_v43 }
 0x113   : > { %v1755_v51 = vadd.f32 %v1754_v19, %v1736_v44  ;;  %v1791_v58 = vadd.f32 %v1790_v17, %v1772_v46 }
 0x118   : > { %v1738_v26 = vpop.f32.mrf.mxu0  ;;  %v1773_v39 = vpop.f32.mrf.mxu2 }
 0x119   : > { %v1792_v25 = vpop.f32.mrf.mxu3  ;;  %v1757_v27 = vpop.f32.mrf.mxu1  ;;  %v1774_v59 = vadd.f32 %v1773_v39, %v1755_v51  ;;  %v1739_v0 = vadd.f32 %v1738_v26, %v1720_v61  ;;  %v2733_v26 = vld [vmem:[%s3323_s4] ss:$0 sm:$0xff] }
 0x11b   : > { %v1793_v62 = vadd.f32 %v1792_v25, %v1774_v59  ;;  %v1758_v1 = vadd.f32 %v1757_v27, %v1739_v0 }
 0x120   : > { %v1740_v35 = vpop.f32.mrf.mxu0  ;;  %v1776_v60 = vpop.f32.mrf.mxu2 }
 0x121   : > { %v1795_v34 = vpop.f32.mrf.mxu3  ;;  %v1759_v36 = vpop.f32.mrf.mxu1  ;;  %v1741_v5 = vadd.f32 %v1740_v35, %v1722_v63  ;;  %v1777_v11 = vadd.f32 %v1776_v60, %v1758_v1 }
 0x123   : > { %v1760_v13 = vadd.f32 %v1759_v36, %v1741_v5  ;;  %v1796_v12 = vadd.f32 %v1795_v34, %v1777_v11 }
 0x128   : > { %v1809_v48 = vpop.f32.mrf.mxu0  ;;  %v1778_v8 = vpop.f32.mrf.mxu2 }
 0x129   : > { %v1797_v47 = vpop.f32.mrf.mxu3  ;;  %v1828_v49 = vpop.f32.mrf.mxu1  ;;  %v1810_v55 = vadd.f32 %v1809_v48, %v1791_v58  ;;  %v1779_v15 = vadd.f32 %v1778_v8, %v1760_v13 }
 0x12b   : > { %v1829_v2 = vadd.f32 %v1828_v49, %v1810_v55  ;;  %v1798_v17 = vadd.f32 %v1797_v47, %v1779_v15 }
 0x12d   : > { %v1838_v9 = vmax.f32 %v1829_v2, 0.0 }
 0x130   : > { %v1811_v56 = vpop.f32.mrf.mxu0 }
 0x131   : > { %v1830_v53 = vpop.f32.mrf.mxu1  ;;  %v1812_v3 = vadd.f32 %v1811_v56, %v1793_v62  ;;  %v1814_v4 = vpop.f32.mrf.mxu3 }
 0x132   : > { %v1815_v18 = vadd.f32 %v1814_v4, %v1796_v12 }
 0x133   : > { %v1831_v7 = vadd.f32 %v1830_v53, %v1812_v3 }
 0x135   : > { %v1839_v10 = vmax.f32 %v1831_v7, 0.0 }
 0x137   : > { %v1842_v14 = vpack.c.bf16 %v1839_v10, %v1838_v9 }
 0x139   : > { %v1833_v6 = vpop.f32.mrf.mxu1  ;;  %2564 = vmatmul.msk.bf16.vlgmr.msra.gmra.mxu2 %vm1876_vm1, %v1842_v14  ;;  %v1816_v16 = vpop.f32.mrf.mxu3 }
 0x13a   : > { %v1817_v19 = vadd.f32 %v1816_v16, %v1798_v17  ;;  %v1834_v20 = vadd.f32 %v1833_v6, %v1815_v18 }
 0x13c   : > { %v1840_v23 = vmax.f32 %v1834_v20, 0.0 }
 0x141   : > { %v1835_v21 = vpop.f32.mrf.mxu1 }
 0x142   : > { %v1836_v22 = vadd.f32 %v1835_v21, %v1817_v19 }
 0x144   : > { %v1841_v24 = vmax.f32 %v1836_v22, 0.0 }
 0x146   : > { %v1843_v25 = vpack.c.bf16 %v1841_v24, %v1840_v23 }
 0x149   : > { %2565 = vmatmul.msk.bf16.gmra.mxu2 %vm1876_vm1, %v1843_v25 }
 0x1bc   : > { %v1896_v27 = vpop.f32.mrf.mxu2 }
 0x1bd   : > { %v1897_v28 = vadd.f32 %v2733_v26, %v1896_v27 }
 0x1bf   : > { %1907 = vst.msk [vmem:[%s229_s13] sm:$0xff] %vm1906_vm2, %v1897_v28 }
 0x1c4   : > { %v1898_v29 = vpop.f32.mrf.mxu2 }
 0x1c5   : > { %v1899_v30 = vadd.f32 %v2733_v26, %v1898_v29 }
 0x1c7   : > { %1908 = vst.msk [vmem:[%s229_s13 + $0x8] sm:$0xff] %vm1906_vm2, %v1899_v30 }
 0x1cc   : > { %v1901_v31 = vpop.f32.mrf.mxu2 }
 0x1cd   : > { %v1902_v32 = vadd.f32 %v2733_v26, %v1901_v31 }
 0x1cf   : > { %1909 = vst.msk [vmem:[%s229_s13 + $0x10] sm:$0xff] %vm1906_vm2, %v1902_v32 }
 0x1d4   : > { %v1903_v33 = vpop.f32.mrf.mxu2 }
 0x1d5   : > { %v1904_v34 = vadd.f32 %v2733_v26, %v1903_v33 }
 0x1d7   : > { %1910 = vst.msk [vmem:[%s229_s13 + $0x18] sm:$0xff] %vm1906_vm2, %v1904_v34 }
 0x1d8 PF: > { %s15_s18 = sadd.s32 1, %s2740_s18  }
 0x1d9   : > { %p12_p4 = scmp.ge.s32.totalorder %s15_s18, 4  }
 0x1db   :  { %14 = sbr.rel (!%p12_p4) target bundleno = 1 (0x1), region = 70 }

</bundles_post_ra>
